<compile_context>
chip_gen: v6e
topology: v6e:2x2x1
jax: 0.10.0
libtpu: 0.0.40
codegen_flags: <defaults>
</compile_context>

<pallas_src>
import functools

import jax
import jax.numpy as jnp
from jax.experimental import pallas as pl
from jax.experimental.pallas import tpu as pltpu

ALPHA = 0.2          # LeakyReLU negative slope
NEG_BIG = -9e15      # masking constant from the reference module
BN_EPS = 1e-5


# ------------------------------- the kernel -------------------------------- #

def _fused_kernel(h_ref, mask_ref, waug_ref, wk1_ref, b1_ref, wk2_ref, b2_ref,
                  o_ref, *, num_heads, head_dim, seq_len):
    """One batch block (Bb sequences), all heads fused.

    h_ref:    (Bb, N, Din)
    mask_ref: (Bb, N, 3)            >0 means "masked out"
    waug_ref: (Din, H*D + 2*H)      [W_h0 | ... | W_h(H-1) | W@a2 cols | W@a1 cols]
    wk1_ref:  (3*H*D, H*D)          block-diagonal conv1 weights, BN1 folded
    b1_ref:   (1, H*D)              folded BN1 bias (all heads)
    wk2_ref:  (3*H*D, H*D)          block-diagonal conv2 weights, BN2 folded
    b2_ref:   (1, H*D)              folded BN2 bias (all heads)
    o_ref:    (Bb, N, HD_pad)       heads concatenated; lane-padded to 128-mult
    """
    H, D, N = num_heads, head_dim, seq_len
    Bb, _, Din = h_ref.shape
    HD = H * D
    R = Bb * N
    HDp = o_ref.shape[2]

    # Flatten (Bb, N) into one tall row slab so every matmul fills MXU rows.
    x = h_ref[...].reshape(R, Din)             # (R, Din)
    mask = mask_ref[...].reshape(R, 3)         # (R, 3)

    # One wide MXU matmul for every head's Wh and the folded a2/a1 projections.
    wh_aug = jnp.dot(x, waug_ref[...], preferred_element_type=jnp.float32)

    # Per-row position inside its own length-N sequence (rows of several batch
    # elements are stacked, so boundary handling must not leak across batches).
    row = jax.lax.broadcasted_iota(jnp.int32, (R, 1), 0)
    if (N & (N - 1)) == 0:                     # power-of-two fast path
        pos = jnp.bitwise_and(row, N - 1)
    else:
        pos = row % N
    is_first = pos == 0
    is_last = pos == N - 1

    def roll_prev(z):
        # row n <- row n-1, circular *within each length-N sequence*.
        main = pltpu.roll(z, shift=1, axis=0)
        wrap_shift = (1 - N) % R
        if wrap_shift == 1:                    # Bb == 1: flat roll is already circular
            return main
        wrap = pltpu.roll(z, shift=wrap_shift, axis=0)
        return jnp.where(is_first, wrap, main)

    def roll_next(z):
        # row n <- row n+1, circular within each sequence.
        main = pltpu.roll(z, shift=(R - 1) % R, axis=0)
        wrap_shift = (N - 1) % R
        if wrap_shift == (R - 1) % R:
            return main
        wrap = pltpu.roll(z, shift=wrap_shift, axis=0)
        return jnp.where(is_last, wrap, main)

    # ---- attention scores, vectorized across heads on (R, H) slabs ----------
    Wh = wh_aug[:, :HD]                        # (R, HD)
    Wh2 = wh_aug[:, HD:HD + H]                 # (R, H)  == Wh_h @ a2_h per head
    Wh1 = wh_aug[:, HD + H:HD + 2 * H]         # (R, H)  == Wh_h @ a1_h per head

    roll_src = wh_aug[:, :HD + H]              # only [Wh | Wh2] is consumed rolled
    prev = roll_prev(roll_src)
    nxt = roll_next(roll_src)
    Wh_prev, Wh2_prev = prev[:, :HD], prev[:, HD:]
    Wh_next, Wh2_next = nxt[:, :HD], nxt[:, HD:]

    m0 = mask[:, 0:1] > 0.0
    m1 = mask[:, 1:2] > 0.0
    m2 = mask[:, 2:3] > 0.0

    def leaky(v):
        return jnp.where(v > 0, v, ALPHA * v)

    e0 = jnp.where(m0, NEG_BIG, leaky(Wh1 + Wh2_prev))       # (R, H)
    e1 = jnp.where(m1, NEG_BIG, leaky(Wh1 + Wh2))
    e2 = jnp.where(m2, NEG_BIG, leaky(Wh1 + Wh2_next))

    # softmax over the 3 neighbours, all heads at once
    mx = jnp.maximum(jnp.maximum(e0, e1), e2)
    p0 = jnp.exp(e0 - mx)
    p1 = jnp.exp(e1 - mx)
    p2 = jnp.exp(e2 - mx)
    inv = pl.reciprocal(p0 + p1 + p2, approx=False)          # exact: 1e-4 tolerance
    p0 = p0 * inv
    p1 = p1 * inv
    p2 = p2 * inv                                            # (R, H)

    # Expand (R, H) -> (R, HD): lane-repeat each head column D times with a
    # tiny one-hot MXU matmul (avoids lane-misaligned reshapes / relayouts).
    col = jax.lax.broadcasted_iota(jnp.int32, (H, HD), 1)
    hrow = jax.lax.broadcasted_iota(jnp.int32, (H, HD), 0)
    lo = hrow * D
    expand = jnp.logical_and(col >= lo, col < lo + D).astype(jnp.float32)  # (H, HD)

    h_new = (jnp.dot(p0, expand, preferred_element_type=jnp.float32) * Wh_prev
             + jnp.dot(p1, expand, preferred_element_type=jnp.float32) * Wh
             + jnp.dot(p2, expand, preferred_element_type=jnp.float32) * Wh_next)

    # ---- LightweightResidualBlock, all heads fused (block-diag conv weights) -
    def conv3(z, wk, bias):
        # Conv1d(k=3, stride=1, zero pad=1), channels-last, ONE matmul for all
        # heads: concat([z[n-1], z[n], z[n+1]], lanes) @ (3HD, HD) block-diag.
        # Cross-batch rows produced by the flat roll are zeroed by the pad mask.
        zp = jnp.where(is_first, 0.0, pltpu.roll(z, shift=1, axis=0))
        zn = jnp.where(is_last, 0.0, pltpu.roll(z, shift=R - 1, axis=0))
        zcat = jnp.concatenate([zp, z, zn], axis=1)                    # (R, 3HD)
        return jnp.dot(zcat, wk, preferred_element_type=jnp.float32) + bias

    out = jnp.maximum(conv3(h_new, wk1_ref[...], b1_ref[...]), 0.0)
    out = conv3(out, wk2_ref[...], b2_ref[...])
    out = jnp.maximum(out + h_new, 0.0)                                # (R, HD)

    # Lane-dense store: zero-pad to the 128-multiple output width, one slab write.
    if HDp != HD:
        out = jnp.concatenate(
            [out, jnp.zeros((R, HDp - HD), jnp.float32)], axis=1)
    o_ref[...] = out.reshape(Bb, N, HDp).astype(o_ref.dtype)


# ------------------------------ pallas wrapper ------------------------------ #

def _pick_batch_block(B, N, rows_target=256, min_steps=2):
    """Largest divisor Bb of B with Bb*N <= rows_target while keeping >= 2 grid
    steps (v7x has 2 TensorCores).  Per-step VMEM stays tiny at these widths;
    re-budget rows_target against 64 MiB if Din/H*D grow large."""
    best = 1
    for bb in range(1, B + 1):
        if B % bb:
            continue
        if bb * N <= rows_target and (B // bb) >= min(min_steps, B):
            best = bb
    return best


def op_multihead_attn_block(h, op_mask, params, activation=None, concat=True,
                            batch_block=None):
    """h: (B, N, Din) f32, op_mask: (B, N, 3) f32 (>0 means masked)."""
    B, N, Din = h.shape
    HD = params["b1"].shape[1]
    HD2 = params["W_aug"].shape[1]
    H = (HD2 - HD) // 2
    D = HD // H

    Bb = batch_block or _pick_batch_block(B, N)
    assert B % Bb == 0, (B, Bb)
    grid = (B // Bb,)

    # Pad the output lane dim to a multiple of 128 so stores are unmasked vst
    # (matters most on v5e's single store slot); sliced off below.
    HD_pad = HD if HD % 128 == 0 else ((HD // 128) + 1) * 128

    kernel = functools.partial(_fused_kernel, num_heads=H, head_dim=D, seq_len=N)

    out = pl.pallas_call(
        kernel,
        out_shape=jax.ShapeDtypeStruct((B, N, HD_pad), jnp.float32),
        grid=grid,
        in_specs=[
            pl.BlockSpec((Bb, N, Din), lambda b: (b, 0, 0)),
            pl.BlockSpec((Bb, N, 3), lambda b: (b, 0, 0)),
            pl.BlockSpec((Din, HD2), lambda b: (0, 0)),
            pl.BlockSpec((3 * HD, HD), lambda b: (0, 0)),
            pl.BlockSpec((1, HD), lambda b: (0, 0)),
            pl.BlockSpec((3 * HD, HD), lambda b: (0, 0)),
            pl.BlockSpec((1, HD), lambda b: (0, 0)),
        ],
        out_specs=pl.BlockSpec((Bb, N, HD_pad), lambda b: (b, 0, 0)),
        compiler_params=pltpu.CompilerParams(
            dimension_semantics=("parallel",)),
    )(h, op_mask,
      params["W_aug"], params["wk1"], params["b1"], params["wk2"], params["b2"])

    if HD_pad != HD:
        out = out[..., :HD]

    if concat:
        h_out = out                               # already torch.cat(..., -1) order
    else:
        h_out = out.reshape(B, N, H, D).mean(axis=2)   # stack + mean over heads
    return h_out if activation is None else activation(h_out)


# --------------------------- deterministic params --------------------------- #

def init_params(key, H, Din, D):
    gain = 1.414
    heads = []
    for _ in range(H):
        (key, kW, ka, kc1, kc2,
         kg1, kb1, km1, kv1, kg2, kb2, km2, kv2) = jax.random.split(key, 13)
        bW = gain * (6.0 / (Din + D)) ** 0.5
        W = jax.random.uniform(kW, (Din, D), jnp.float32, -bW, bW)
        bA = gain * (6.0 / (2 * D + 1)) ** 0.5
        a = jax.random.uniform(ka, (2 * D, 1), jnp.float32, -bA, bA)
        bc = (1.0 / (D * 3)) ** 0.5
        cw1 = jax.random.uniform(kc1, (D, D, 3), jnp.float32, -bc, bc)
        cw2 = jax.random.uniform(kc2, (D, D, 3), jnp.float32, -bc, bc)
        heads.append(dict(
            W=W, a=a, cw1=cw1, cw2=cw2,
            g1=1.0 + 0.1 * jax.random.normal(kg1, (D,), jnp.float32),
            be1=0.1 * jax.random.normal(kb1, (D,), jnp.float32),
            m1=0.1 * jax.random.normal(km1, (D,), jnp.float32),
            v1=jax.random.uniform(kv1, (D,), jnp.float32, 0.5, 1.5),
            g2=1.0 + 0.1 * jax.random.normal(kg2, (D,), jnp.float32),
            be2=0.1 * jax.random.normal(kb2, (D,), jnp.float32),
            m2=0.1 * jax.random.normal(km2, (D,), jnp.float32),
            v2=jax.random.uniform(kv2, (D,), jnp.float32, 0.5, 1.5),
        ))

    HD = H * D

    def fold_bn(g, b, m, v):
        s = g / jnp.sqrt(v + BN_EPS)
        return s, b - m * s

    # One wide projection: [W_h | ... | W@a2 columns | W@a1 columns]
    # (a2 right after the Wh block so the rolled slab [Wh | Wh2] is contiguous)
    W_all = jnp.concatenate([p["W"] for p in heads], axis=1)            # (Din, HD)
    A1 = jnp.stack([p["W"] @ p["a"][:D, 0] for p in heads], axis=1)     # (Din, H)
    A2 = jnp.stack([p["W"] @ p["a"][D:, 0] for p in heads], axis=1)     # (Din, H)
    W_aug = jnp.concatenate([W_all, A2, A1], axis=1)                    # (Din, HD+2H)

    # Block-diagonal conv weights (all heads in one matmul), BN scale folded.
    # Row index = tap*HD + head*D + in_channel; col index = head*D + out_channel.
    wk1 = jnp.zeros((3 * HD, HD), jnp.float32)
    wk2 = jnp.zeros((3 * HD, HD), jnp.float32)
    b1_l, b2_l = [], []
    for hh, p in enumerate(heads):
        s1, bias1 = fold_bn(p["g1"], p["be1"], p["m1"], p["v1"])
        s2, bias2 = fold_bn(p["g2"], p["be2"], p["m2"], p["v2"])
        # torch conv weight (out, in, k) -> (k, in, out), fold per-out BN scale
        wkh1 = jnp.transpose(p["cw1"], (2, 1, 0)) * s1[None, None, :]   # (3, D, D)
        wkh2 = jnp.transpose(p["cw2"], (2, 1, 0)) * s2[None, None, :]
        for tap in range(3):
            r0 = tap * HD + hh * D
            wk1 = wk1.at[r0:r0 + D, hh * D:(hh + 1) * D].set(wkh1[tap])
            wk2 = wk2.at[r0:r0 + D, hh * D:(hh + 1) * D].set(wkh2[tap])
        b1_l.append(bias1)
        b2_l.append(bias2)

    kernel_params = {
        "W_aug": W_aug,                                      # (Din, HD + 2H)
        "wk1": wk1,                                          # (3HD, HD) block-diag
        "b1": jnp.concatenate(b1_l).reshape(1, HD),          # (1, HD)
        "wk2": wk2,
        "b2": jnp.concatenate(b2_l).reshape(1, HD),
    }
    return heads, kernel_params


# ----------------------------- pure-JAX reference --------------------------- #

def reference(h, op_mask, head_params):
    outs = []
    D = head_params[0]["W"].shape[1]
    for p in head_params:
        Wh = jnp.einsum("bni,io->bno", h, p["W"])
        Wh_concat = jnp.stack(
            [jnp.roll(Wh, 1, axis=1), Wh, jnp.roll(Wh, -1, axis=1)], axis=-2)
        Wh1 = Wh @ p["a"][:D, :]
        Wh2 = Wh @ p["a"][D:, :]
        Wh2_concat = jnp.stack(
            [jnp.roll(Wh2, 1, axis=1), Wh2, jnp.roll(Wh2, -1, axis=1)], axis=-1)
        e = Wh1[..., None] + Wh2_concat
        e = jnp.where(e > 0, e, ALPHA * e)
        att = jnp.where(op_mask[:, :, None, :] > 0, NEG_BIG * jnp.ones_like(e), e)
        att = jax.nn.softmax(att, axis=-1)
        h_new = jnp.squeeze(att @ Wh_concat, axis=-2)

        x = jnp.transpose(h_new, (0, 2, 1))  # NCW, like PyTorch

        def conv1d(z, w):
            return jax.lax.conv_general_dilated(
                z, w, window_strides=(1,), padding=((1, 1),),
                dimension_numbers=("NCH", "OIH", "NCH"))

        def bn(z, g, b, m, v):
            return ((z - m[None, :, None]) / jnp.sqrt(v[None, :, None] + BN_EPS)
                    * g[None, :, None] + b[None, :, None])

        out = jax.nn.relu(bn(conv1d(x, p["cw1"]), p["g1"], p["be1"], p["m1"], p["v1"]))
        out = bn(conv1d(out, p["cw2"]), p["g2"], p["be2"], p["m2"], p["v2"])
        out = jax.nn.relu(out + x)
        outs.append(jnp.transpose(out, (0, 2, 1)))
    return jnp.concatenate(outs, axis=-1)


# ------------------------------------ main ----------------------------------- #

if __name__ == "__main__":
    B, N, Din, D, H = 2, 8, 16, 32, 2
    key = jax.random.PRNGKey(0)
    k_h, k_m, k_p = jax.random.split(key, 3)

    h = jax.random.normal(k_h, (B, N, Din), jnp.float32)
    op_mask = (jax.random.uniform(k_m, (B, N, 3)) > 0.7).astype(jnp.float32)

    head_params, kernel_params = init_params(k_p, H, Din, D)

    fn = jax.jit(functools.partial(op_multihead_attn_block,
                                   params=kernel_params,
                                   activation=None, concat=True))
    out = fn(h, op_mask)
    jax.block_until_ready(out)

    ref = reference(h, op_mask, head_params)
    assert out.shape == (B, N, H * D), out.shape
    max_err = float(jnp.max(jnp.abs(out - ref)))
    assert jnp.allclose(out, ref, rtol=1e-4, atol=1e-4), max_err

    print("KERNEL_OK")
</pallas_src>

<mosaic_0001>
module attributes {stable_mosaic.version = 11 : i64} {
  func.func @_fused_kernel(%arg0: i32, %arg1: memref<1x8x16xf32, #tpu.memory_space<vmem>>, %arg2: memref<1x8x3xf32, #tpu.memory_space<vmem>>, %arg3: memref<16x68xf32, #tpu.memory_space<vmem>>, %arg4: memref<192x64xf32, #tpu.memory_space<vmem>>, %arg5: memref<1x64xf32, #tpu.memory_space<vmem>>, %arg6: memref<192x64xf32, #tpu.memory_space<vmem>>, %arg7: memref<1x64xf32, #tpu.memory_space<vmem>>, %arg8: memref<1x8x128xf32, #tpu.memory_space<vmem>>) attributes {dimension_semantics = [#tpu.dimension_semantics<parallel>], iteration_bounds = array<i64: 2>, scalar_prefetch = 0 : i64, scratch_operands = 0 : i64, tpu.core_type = #tpu.core_type<tc>, window_params = [{transform_indices = @transform_0, window_bounds = array<i64: 1, 8, 16>}, {transform_indices = @transform_1, window_bounds = array<i64: 1, 8, 3>}, {pipeline_mode = #tpu.pipeline_mode<synchronous>, transform_indices = @transform_2, window_bounds = array<i64: 16, 68>}, {pipeline_mode = #tpu.pipeline_mode<synchronous>, transform_indices = @transform_3, window_bounds = array<i64: 192, 64>}, {pipeline_mode = #tpu.pipeline_mode<synchronous>, transform_indices = @transform_4, window_bounds = array<i64: 1, 64>}, {pipeline_mode = #tpu.pipeline_mode<synchronous>, transform_indices = @transform_5, window_bounds = array<i64: 192, 64>}, {pipeline_mode = #tpu.pipeline_mode<synchronous>, transform_indices = @transform_6, window_bounds = array<i64: 1, 64>}, {transform_indices = @transform_7, window_bounds = array<i64: 1, 8, 128>}]} {
    %c0 = arith.constant 0 : index
    %c0_0 = arith.constant 0 : index
    %c0_1 = arith.constant 0 : index
    %0 = vector.load %arg1[%c0, %c0_0, %c0_1] : memref<1x8x16xf32, #tpu.memory_space<vmem>>, vector<1x8x16xf32>
    %1 = vector.shape_cast %0 : vector<1x8x16xf32> to vector<8x16xf32>
    %c0_2 = arith.constant 0 : index
    %c0_3 = arith.constant 0 : index
    %c0_4 = arith.constant 0 : index
    %2 = vector.load %arg2[%c0_2, %c0_3, %c0_4] : memref<1x8x3xf32, #tpu.memory_space<vmem>>, vector<1x8x3xf32>
    %3 = vector.shape_cast %2 : vector<1x8x3xf32> to vector<8x3xf32>
    %c0_5 = arith.constant 0 : index
    %c0_6 = arith.constant 0 : index
    %4 = vector.load %arg3[%c0_5, %c0_6] : memref<16x68xf32, #tpu.memory_space<vmem>>, vector<16x68xf32>
    %cst = arith.constant dense<0.000000e+00> : vector<8x68xf32>
    %5 = tpu.matmul %1, %4, %cst {dimension_numbers = #tpu.dot_dimension_numbers<[1], [0], [0], [1], [0, 0, 1, 1], [], []>} : vector<8x16xf32>, vector<16x68xf32>, vector<8x68xf32> -> vector<8x68xf32>
    %6 = tpu.iota {dimensions = array<i32: 0>} : vector<8x1xi32>
    %c7_i32 = arith.constant 7 : i32
    %7 = vector.broadcast %c7_i32 : i32 to vector<8x1xi32>
    %8 = arith.andi %6, %7 : vector<8x1xi32>
    %c0_i32 = arith.constant 0 : i32
    %9 = vector.broadcast %c0_i32 : i32 to vector<8x1xi32>
    %10 = arith.cmpi eq, %8, %9 : vector<8x1xi32>
    %c7_i32_7 = arith.constant 7 : i32
    %11 = vector.broadcast %c7_i32_7 : i32 to vector<8x1xi32>
    %12 = arith.cmpi eq, %8, %11 : vector<8x1xi32>
    %13 = vector.extract_strided_slice %5 {offsets = [0, 0], sizes = [8, 64], strides = [1, 1]} : vector<8x68xf32> to vector<8x64xf32>
    %14 = vector.extract_strided_slice %5 {offsets = [0, 64], sizes = [8, 2], strides = [1, 1]} : vector<8x68xf32> to vector<8x2xf32>
    %15 = vector.extract_strided_slice %5 {offsets = [0, 66], sizes = [8, 2], strides = [1, 1]} : vector<8x68xf32> to vector<8x2xf32>
    %16 = vector.extract_strided_slice %5 {offsets = [0, 0], sizes = [8, 66], strides = [1, 1]} : vector<8x68xf32> to vector<8x66xf32>
    %c1_i32 = arith.constant 1 : i32
    %17 = tpu.dynamic_rotate %16 by %c1_i32 dim 0 : vector<8x66xf32>, i32 -> vector<8x66xf32>
    %c7_i32_8 = arith.constant 7 : i32
    %18 = tpu.dynamic_rotate %16 by %c7_i32_8 dim 0 : vector<8x66xf32>, i32 -> vector<8x66xf32>
    %19 = vector.extract_strided_slice %17 {offsets = [0, 0], sizes = [8, 64], strides = [1, 1]} : vector<8x66xf32> to vector<8x64xf32>
    %20 = vector.extract_strided_slice %17 {offsets = [0, 64], sizes = [8, 2], strides = [1, 1]} : vector<8x66xf32> to vector<8x2xf32>
    %21 = vector.extract_strided_slice %18 {offsets = [0, 0], sizes = [8, 64], strides = [1, 1]} : vector<8x66xf32> to vector<8x64xf32>
    %22 = vector.extract_strided_slice %18 {offsets = [0, 64], sizes = [8, 2], strides = [1, 1]} : vector<8x66xf32> to vector<8x2xf32>
    %23 = vector.extract_strided_slice %3 {offsets = [0, 0], sizes = [8, 1], strides = [1, 1]} : vector<8x3xf32> to vector<8x1xf32>
    %cst_9 = arith.constant 0.000000e+00 : f32
    %24 = vector.broadcast %cst_9 : f32 to vector<8x1xf32>
    %25 = arith.cmpf ogt, %23, %24 : vector<8x1xf32>
    %26 = vector.extract_strided_slice %3 {offsets = [0, 1], sizes = [8, 1], strides = [1, 1]} : vector<8x3xf32> to vector<8x1xf32>
    %cst_10 = arith.constant 0.000000e+00 : f32
    %27 = vector.broadcast %cst_10 : f32 to vector<8x1xf32>
    %28 = arith.cmpf ogt, %26, %27 : vector<8x1xf32>
    %29 = vector.extract_strided_slice %3 {offsets = [0, 2], sizes = [8, 1], strides = [1, 1]} : vector<8x3xf32> to vector<8x1xf32>
    %cst_11 = arith.constant 0.000000e+00 : f32
    %30 = vector.broadcast %cst_11 : f32 to vector<8x1xf32>
    %31 = arith.cmpf ogt, %29, %30 : vector<8x1xf32>
    %32 = arith.addf %15, %20 : vector<8x2xf32>
    %cst_12 = arith.constant 0.000000e+00 : f32
    %33 = vector.broadcast %cst_12 : f32 to vector<8x2xf32>
    %34 = arith.cmpf ogt, %32, %33 : vector<8x2xf32>
    %cst_13 = arith.constant 2.000000e-01 : f32
    %35 = vector.broadcast %cst_13 : f32 to vector<8x2xf32>
    %36 = arith.mulf %35, %32 : vector<8x2xf32>
    %37 = arith.select %34, %32, %36 : vector<8x2xi1>, vector<8x2xf32>
    %cst_14 = arith.constant -9.000000e+15 : f32
    %38 = vector.shape_cast %25 : vector<8x1xi1> to vector<8x1xi1>
    %39 = vector.broadcast %38 : vector<8x1xi1> to vector<8x2xi1>
    %40 = vector.broadcast %cst_14 : f32 to vector<8x2xf32>
    %41 = arith.select %39, %40, %37 : vector<8x2xi1>, vector<8x2xf32>
    %42 = arith.addf %15, %14 : vector<8x2xf32>
    %cst_15 = arith.constant 0.000000e+00 : f32
    %43 = vector.broadcast %cst_15 : f32 to vector<8x2xf32>
    %44 = arith.cmpf ogt, %42, %43 : vector<8x2xf32>
    %cst_16 = arith.constant 2.000000e-01 : f32
    %45 = vector.broadcast %cst_16 : f32 to vector<8x2xf32>
    %46 = arith.mulf %45, %42 : vector<8x2xf32>
    %47 = arith.select %44, %42, %46 : vector<8x2xi1>, vector<8x2xf32>
    %cst_17 = arith.constant -9.000000e+15 : f32
    %48 = vector.shape_cast %28 : vector<8x1xi1> to vector<8x1xi1>
    %49 = vector.broadcast %48 : vector<8x1xi1> to vector<8x2xi1>
    %50 = vector.broadcast %cst_17 : f32 to vector<8x2xf32>
    %51 = arith.select %49, %50, %47 : vector<8x2xi1>, vector<8x2xf32>
    %52 = arith.addf %15, %22 : vector<8x2xf32>
    %cst_18 = arith.constant 0.000000e+00 : f32
    %53 = vector.broadcast %cst_18 : f32 to vector<8x2xf32>
    %54 = arith.cmpf ogt, %52, %53 : vector<8x2xf32>
    %cst_19 = arith.constant 2.000000e-01 : f32
    %55 = vector.broadcast %cst_19 : f32 to vector<8x2xf32>
    %56 = arith.mulf %55, %52 : vector<8x2xf32>
    %57 = arith.select %54, %52, %56 : vector<8x2xi1>, vector<8x2xf32>
    %cst_20 = arith.constant -9.000000e+15 : f32
    %58 = vector.shape_cast %31 : vector<8x1xi1> to vector<8x1xi1>
    %59 = vector.broadcast %58 : vector<8x1xi1> to vector<8x2xi1>
    %60 = vector.broadcast %cst_20 : f32 to vector<8x2xf32>
    %61 = arith.select %59, %60, %57 : vector<8x2xi1>, vector<8x2xf32>
    %62 = arith.maximumf %41, %51 : vector<8x2xf32>
    %63 = arith.maximumf %62, %61 : vector<8x2xf32>
    %64 = arith.subf %41, %63 : vector<8x2xf32>
    %65 = math.exp %64 : vector<8x2xf32>
    %66 = arith.subf %51, %63 : vector<8x2xf32>
    %67 = math.exp %66 : vector<8x2xf32>
    %68 = arith.subf %61, %63 : vector<8x2xf32>
    %69 = math.exp %68 : vector<8x2xf32>
    %70 = arith.addf %65, %67 : vector<8x2xf32>
    %71 = arith.addf %70, %69 : vector<8x2xf32>
    %72 = tpu.reciprocal %71 : vector<8x2xf32> -> vector<8x2xf32>
    %73 = arith.mulf %65, %72 : vector<8x2xf32>
    %74 = arith.mulf %67, %72 : vector<8x2xf32>
    %75 = arith.mulf %69, %72 : vector<8x2xf32>
    %76 = tpu.iota {dimensions = array<i32: 1>} : vector<2x64xi32>
    %77 = tpu.iota {dimensions = array<i32: 0>} : vector<2x64xi32>
    %c32_i32 = arith.constant 32 : i32
    %78 = vector.broadcast %c32_i32 : i32 to vector<2x64xi32>
    %79 = arith.muli %77, %78 : vector<2x64xi32>
    %80 = arith.cmpi sge, %76, %79 : vector<2x64xi32>
    %c32_i32_21 = arith.constant 32 : i32
    %81 = vector.broadcast %c32_i32_21 : i32 to vector<2x64xi32>
    %82 = arith.addi %79, %81 : vector<2x64xi32>
    %83 = arith.cmpi slt, %76, %82 : vector<2x64xi32>
    %84 = arith.andi %80, %83 : vector<2x64xi1>
    %85 = arith.extui %84 : vector<2x64xi1> to vector<2x64xi32>
    %86 = arith.sitofp %85 : vector<2x64xi32> to vector<2x64xf32>
    %cst_22 = arith.constant dense<0.000000e+00> : vector<8x64xf32>
    %87 = tpu.matmul %73, %86, %cst_22 {dimension_numbers = #tpu.dot_dimension_numbers<[1], [0], [0], [1], [0, 0, 1, 1], [], []>} : vector<8x2xf32>, vector<2x64xf32>, vector<8x64xf32> -> vector<8x64xf32>
    %88 = arith.mulf %87, %19 : vector<8x64xf32>
    %cst_23 = arith.constant dense<0.000000e+00> : vector<8x64xf32>
    %89 = tpu.matmul %74, %86, %cst_23 {dimension_numbers = #tpu.dot_dimension_numbers<[1], [0], [0], [1], [0, 0, 1, 1], [], []>} : vector<8x2xf32>, vector<2x64xf32>, vector<8x64xf32> -> vector<8x64xf32>
    %90 = arith.mulf %89, %13 : vector<8x64xf32>
    %91 = arith.addf %88, %90 : vector<8x64xf32>
    %cst_24 = arith.constant dense<0.000000e+00> : vector<8x64xf32>
    %92 = tpu.matmul %75, %86, %cst_24 {dimension_numbers = #tpu.dot_dimension_numbers<[1], [0], [0], [1], [0, 0, 1, 1], [], []>} : vector<8x2xf32>, vector<2x64xf32>, vector<8x64xf32> -> vector<8x64xf32>
    %93 = arith.mulf %92, %21 : vector<8x64xf32>
    %94 = arith.addf %91, %93 : vector<8x64xf32>
    %c0_25 = arith.constant 0 : index
    %c0_26 = arith.constant 0 : index
    %95 = vector.load %arg4[%c0_25, %c0_26] : memref<192x64xf32, #tpu.memory_space<vmem>>, vector<192x64xf32>
    %c0_27 = arith.constant 0 : index
    %c0_28 = arith.constant 0 : index
    %96 = vector.load %arg5[%c0_27, %c0_28] : memref<1x64xf32, #tpu.memory_space<vmem>>, vector<1x64xf32>
    %c1_i32_29 = arith.constant 1 : i32
    %97 = tpu.dynamic_rotate %94 by %c1_i32_29 dim 0 : vector<8x64xf32>, i32 -> vector<8x64xf32>
    %cst_30 = arith.constant 0.000000e+00 : f32
    %98 = vector.shape_cast %10 : vector<8x1xi1> to vector<8x1xi1>
    %99 = vector.broadcast %98 : vector<8x1xi1> to vector<8x64xi1>
    %100 = vector.broadcast %cst_30 : f32 to vector<8x64xf32>
    %101 = arith.select %99, %100, %97 : vector<8x64xi1>, vector<8x64xf32>
    %c7_i32_31 = arith.constant 7 : i32
    %102 = tpu.dynamic_rotate %94 by %c7_i32_31 dim 0 : vector<8x64xf32>, i32 -> vector<8x64xf32>
    %cst_32 = arith.constant 0.000000e+00 : f32
    %103 = vector.shape_cast %12 : vector<8x1xi1> to vector<8x1xi1>
    %104 = vector.broadcast %103 : vector<8x1xi1> to vector<8x64xi1>
    %105 = vector.broadcast %cst_32 : f32 to vector<8x64xf32>
    %106 = arith.select %104, %105, %102 : vector<8x64xi1>, vector<8x64xf32>
    %107 = tpu.concatenate %101, %94, %106 in 1 : vector<8x64xf32>, vector<8x64xf32>, vector<8x64xf32> -> vector<8x192xf32>
    %cst_33 = arith.constant dense<0.000000e+00> : vector<8x64xf32>
    %108 = tpu.matmul %107, %95, %cst_33 {dimension_numbers = #tpu.dot_dimension_numbers<[1], [0], [0], [1], [0, 0, 1, 1], [], []>} : vector<8x192xf32>, vector<192x64xf32>, vector<8x64xf32> -> vector<8x64xf32>
    %109 = vector.broadcast %96 : vector<1x64xf32> to vector<8x64xf32>
    %110 = arith.addf %108, %109 : vector<8x64xf32>
    %cst_34 = arith.constant 0.000000e+00 : f32
    %111 = vector.broadcast %cst_34 : f32 to vector<8x64xf32>
    %112 = arith.maximumf %110, %111 : vector<8x64xf32>
    %c0_35 = arith.constant 0 : index
    %c0_36 = arith.constant 0 : index
    %113 = vector.load %arg6[%c0_35, %c0_36] : memref<192x64xf32, #tpu.memory_space<vmem>>, vector<192x64xf32>
    %c0_37 = arith.constant 0 : index
    %c0_38 = arith.constant 0 : index
    %114 = vector.load %arg7[%c0_37, %c0_38] : memref<1x64xf32, #tpu.memory_space<vmem>>, vector<1x64xf32>
    %c1_i32_39 = arith.constant 1 : i32
    %115 = tpu.dynamic_rotate %112 by %c1_i32_39 dim 0 : vector<8x64xf32>, i32 -> vector<8x64xf32>
    %cst_40 = arith.constant 0.000000e+00 : f32
    %116 = vector.shape_cast %10 : vector<8x1xi1> to vector<8x1xi1>
    %117 = vector.broadcast %116 : vector<8x1xi1> to vector<8x64xi1>
    %118 = vector.broadcast %cst_40 : f32 to vector<8x64xf32>
    %119 = arith.select %117, %118, %115 : vector<8x64xi1>, vector<8x64xf32>
    %c7_i32_41 = arith.constant 7 : i32
    %120 = tpu.dynamic_rotate %112 by %c7_i32_41 dim 0 : vector<8x64xf32>, i32 -> vector<8x64xf32>
    %cst_42 = arith.constant 0.000000e+00 : f32
    %121 = vector.shape_cast %12 : vector<8x1xi1> to vector<8x1xi1>
    %122 = vector.broadcast %121 : vector<8x1xi1> to vector<8x64xi1>
    %123 = vector.broadcast %cst_42 : f32 to vector<8x64xf32>
    %124 = arith.select %122, %123, %120 : vector<8x64xi1>, vector<8x64xf32>
    %125 = tpu.concatenate %119, %112, %124 in 1 : vector<8x64xf32>, vector<8x64xf32>, vector<8x64xf32> -> vector<8x192xf32>
    %cst_43 = arith.constant dense<0.000000e+00> : vector<8x64xf32>
    %126 = tpu.matmul %125, %113, %cst_43 {dimension_numbers = #tpu.dot_dimension_numbers<[1], [0], [0], [1], [0, 0, 1, 1], [], []>} : vector<8x192xf32>, vector<192x64xf32>, vector<8x64xf32> -> vector<8x64xf32>
    %127 = vector.broadcast %114 : vector<1x64xf32> to vector<8x64xf32>
    %128 = arith.addf %126, %127 : vector<8x64xf32>
    %129 = arith.addf %128, %94 : vector<8x64xf32>
    %cst_44 = arith.constant 0.000000e+00 : f32
    %130 = vector.broadcast %cst_44 : f32 to vector<8x64xf32>
    %131 = arith.maximumf %129, %130 : vector<8x64xf32>
    %cst_45 = arith.constant 0.000000e+00 : f32
    %132 = vector.broadcast %cst_45 : f32 to vector<8x64xf32>
    %133 = tpu.concatenate %131, %132 in 1 : vector<8x64xf32>, vector<8x64xf32> -> vector<8x128xf32>
    %134 = vector.shape_cast %133 : vector<8x128xf32> to vector<1x8x128xf32>
    %c0_46 = arith.constant 0 : index
    %c0_47 = arith.constant 0 : index
    %c0_48 = arith.constant 0 : index
    %135 = vector.load %arg8[%c0_46, %c0_47, %c0_48] : memref<1x8x128xf32, #tpu.memory_space<vmem>>, vector<1x8x128xf32>
    tpu.vector_store %arg8[%c0_46, %c0_47, %c0_48], %134 {strides = array<i32>} : memref<1x8x128xf32, #tpu.memory_space<vmem>>, vector<1x8x128xf32>,
    return
  }
  func.func @transform_0(%arg0: i32) -> (i32, i32, i32) {
    %c0_i32 = arith.constant 0 : i32
    %c0_i32_0 = arith.constant 0 : i32
    %c0_i32_1 = arith.constant 0 : i32
    return %arg0, %c0_i32, %c0_i32_0 : i32, i32, i32
  }
  func.func @transform_1(%arg0: i32) -> (i32, i32, i32) {
    %c0_i32 = arith.constant 0 : i32
    %c0_i32_0 = arith.constant 0 : i32
    %c0_i32_1 = arith.constant 0 : i32
    return %arg0, %c0_i32, %c0_i32_0 : i32, i32, i32
  }
  func.func @transform_2(%arg0: i32) -> (i32, i32) {
    %c0_i32 = arith.constant 0 : i32
    %c0_i32_0 = arith.constant 0 : i32
    %c0_i32_1 = arith.constant 0 : i32
    return %c0_i32, %c0_i32_0 : i32, i32
  }
  func.func @transform_3(%arg0: i32) -> (i32, i32) {
    %c0_i32 = arith.constant 0 : i32
    %c0_i32_0 = arith.constant 0 : i32
    %c0_i32_1 = arith.constant 0 : i32
    return %c0_i32, %c0_i32_0 : i32, i32
  }
  func.func @transform_4(%arg0: i32) -> (i32, i32) {
    %c0_i32 = arith.constant 0 : i32
    %c0_i32_0 = arith.constant 0 : i32
    %c0_i32_1 = arith.constant 0 : i32
    return %c0_i32, %c0_i32_0 : i32, i32
  }
  func.func @transform_5(%arg0: i32) -> (i32, i32) {
    %c0_i32 = arith.constant 0 : i32
    %c0_i32_0 = arith.constant 0 : i32
    %c0_i32_1 = arith.constant 0 : i32
    return %c0_i32, %c0_i32_0 : i32, i32
  }
  func.func @transform_6(%arg0: i32) -> (i32, i32) {
    %c0_i32 = arith.constant 0 : i32
    %c0_i32_0 = arith.constant 0 : i32
    %c0_i32_1 = arith.constant 0 : i32
    return %c0_i32, %c0_i32_0 : i32, i32
  }
  func.func @transform_7(%arg0: i32) -> (i32, i32, i32) {
    %c0_i32 = arith.constant 0 : i32
    %c0_i32_0 = arith.constant 0 : i32
    %c0_i32_1 = arith.constant 0 : i32
    return %arg0, %c0_i32, %c0_i32_0 : i32, i32, i32
  }
}

</mosaic_0001>

<bundles_post_ra>
// kernel: op_multihead_attn_block.1
= control target key start
LH: loop header
LB: loop body
LE: loop exit
PB: predicated region body
PF: predicated region fallthrough
CT: control target
= control target key end

     0   :  { %12 = vsyncpa [#allocation3], 0  ;;  %s1694_s0 = inlined_call_operand.vmem [shape: f32[2,8,16], index: 0, kind: input, shape index: {}]   ;;  %s1695_s1 = inlined_call_operand.vmem [shape: f32[2,8,3], index: 1, kind: input, shape index: {}]   ;;  %s1696_s2 = inlined_call_operand.hbm [shape: f32[16,68], index: 2, kind: input, shape index: {}]   ;;  %s1697_s3 = inlined_call_operand.hbm [shape: f32[192,64], index: 3, kind: input, shape index: {}]   ;;  %s1698_s4 = inlined_call_operand.vmem [shape: f32[1,64], index: 4, kind: input, shape index: {}]   ;;  %s1699_s5 = inlined_call_operand.hbm [shape: f32[192,64], index: 5, kind: input, shape index: {}]   ;;  %s1700_s6 = inlined_call_operand.vmem [shape: f32[1,64], index: 6, kind: input, shape index: {}]   ;;  %s1701_s7 = inlined_call_operand.hbm [shape: f32[2,8,128], index: 7, kind: output, shape index: {}]  }
   0x1   :  { %13 = vsyncpa [#allocation6], 0 }
   0x2   :  { %14 = vsyncpa [#allocation4], 0 }
   0x3   :  { %16 = vsyncpa [#allocation4 + $0x1], 0  ;;  %s1428_s24 = smov 0   ;;  %s1430_s25 = smov 0  }
   0x4   :  { %s1432_s26 = smov 0   ;;  %s1434_s27 = smov 0  }
   0x5 LB: > { %s1449_s28 = sadd.s32 4294967295, %s1372_s27   ;;  %s1074_s29 = sadd.s32 4294967294, %s1372_s27   ;;  %s1372_s27 = sphi %s1434_s27, %s1721_s27   ;;  %s1368_s26 = sphi %s1432_s26, %s1720_s26   ;;  %s1364_s25 = sphi %s1430_s25, %s1719_s25   ;;  %s1360_s24 = sphi %s1428_s24, %s1718_s24  }
   0x6   : > { %s1453_s30 = sadd.s32 1, %s1372_s27   ;;  %s186_s8 = sadd.s32 1, %s1368_s26 }
   0x7   : > { %s183_s9 = ssub.s32 %s1372_s27, %s1453_s30  ;;  %p196_p0 = scmp.ne.s32.totalorder %s1368_s26, %s1364_s25 }
   0x8   : > { %p184_p1 = scmp.eq.s32.totalorder %s183_s9, 0  ;;  %p197_p2 = scmp.eq.s32.totalorder %s1449_s28, 1 }
   0x9   : > { %p202_p3 = scmp.ne.s32.totalorder %s1364_s25, %s1360_s24  ;;  %p203_p4 = scmp.eq.s32.totalorder %s1074_s29, 1 }
   0xa   : > { %s1464_s10 = scalar_select %p184_p1, %s1368_s26, %s186_s8  }
   0xb   : > { %p1466_p5 = por %p197_p2, %p196_p0  ;;  %p1470_p6 = por %p203_p4, %p202_p3 }
   0xc   : > { %p1075_p7 = scmp.ge.s32.totalorder %s1372_s27, 1  ;;  %p210_p8 = scmp.lt.s32.totalorder %s1372_s27, 3 }
   0xd   : > { %s1704_s11 = scalar_select %p1466_p5, 1, 0 }
   0xe   : > { %s1705_s12 = scalar_select %p1470_p6, 1, 0 }
   0xf   : > { %p1702_p9 = scmp.eq.s32.totalorder %s1449_s28, 0  ;;  %p1477_p10 = pnand %p1075_p7, %p210_p8 }
  0x10   : > { %s1374_s14 = smov [#allocation5]   ;;  %s1375_s17 = smov [#allocation2]  }
  0x11   : > { %p1148_p11 = pneg %p1477_p10  ;;  %s235_s15 = sshll.u32 %s1374_s14, 4  ;;  %s236_s15 = int_to_ptr.vmem [resolvable:$true] %s235_s15 }
  0x12   : > { %s222_s18 = sshll.u32 %s1375_s17, 4  ;;  %s1376_s19 = smov [#allocation7]   ;;  %s223_s18 = int_to_ptr.vmem [resolvable:$true] %s222_s18 }
  0x13   : > { %p1485_p12 = pnand %p1702_p9, %p1148_p11  ;;  %s251_s20 = sshll.u32 %s1376_s19, 4  ;;  %s252_s20 = int_to_ptr.vmem [resolvable:$true] %s251_s20 }
  0x14   : > { %s1237_s21 = scalar_lea.vmem %s236_s15, 3072  ;;  %p1245_p3 = scmp.lt.s32.totalorder %s236_s15, %s236_s15 }
  0x15   : > { %p1228_p13 = pneg %p1485_p12  ;;  %p1238_p0 = scmp.ne.s32.totalorder %s236_s15, %s1237_s21 }
  0x16   : > { %p1246_p4 = scmp.lt.s32.totalorder %s1237_s21, %s1237_s21 }
  0x17   : > { %p1240_p1 = pnand %p1238_p0, %p1228_p13 }
  0x18   : > { %p1247_p7 = por %p1246_p4, %p1245_p3 }
  0x19   : > { %p1241_p2 = pneg %p1240_p1 }
  0x1b   : > { %p1248_p8 = pnand %p1247_p7, %p1241_p2 }
  0x1d   : > { %1251 = shalt.err (!%p1248_p8)
}
  0x1e   : > { %s1377_s22 = smov 128   ;;  %s1378_s23 = smov 8  }
  0x1f   : > { %1154 = dma.hbm_to_vmem [thread:$0]  (!%p1485_p12), %s1697_s3, 3072, %s236_s15, [#allocation6], %s1377_s22, %s1377_s22, %s1378_s23  }
  0x20   : > { %s1263_s9 = scalar_lea.vmem %s223_s18, 256  ;;  %p1271_p9 = scmp.lt.s32.totalorder %s223_s18, %s223_s18 }
  0x21   : > { %p1264_p11 = scmp.ne.s32.totalorder %s223_s18, %s1263_s9  ;;  %p1272_p6 = scmp.lt.s32.totalorder %s1263_s9, %s1263_s9 }
  0x23   : > { %p1266_p0 = pnand %p1264_p11, %p1228_p13  ;;  %p1273_p3 = por %p1272_p6, %p1271_p9 }
  0x25   : > { %p1267_p1 = pneg %p1266_p0 }
  0x27   : > { %p1274_p2 = pnand %p1273_p3, %p1267_p1 }
  0x29   : > { %1277 = shalt.err (!%p1274_p2)
}
  0x2a   : > { %1151 = dma.hbm_to_vmem [thread:$0]  (!%p1485_p12), %s1696_s2, 256, %s223_s18, [#allocation3], %s1377_s22, %s1377_s22, %s1378_s23  }
  0x2b   : > { %s1289_s15 = scalar_lea.vmem %s252_s20, 3072  ;;  %p1297_p11 = scmp.lt.s32.totalorder %s252_s20, %s252_s20 }
  0x2c   : > { %p1290_p4 = scmp.ne.s32.totalorder %s252_s20, %s1289_s15  ;;  %p1298_p0 = scmp.lt.s32.totalorder %s1289_s15, %s1289_s15 }
  0x2e   : > { %p1292_p7 = pnand %p1290_p4, %p1228_p13  ;;  %p1299_p5 = por %p1298_p0, %p1297_p11 }
  0x30   : > { %p1293_p8 = pneg %p1292_p7 }
  0x32   : > { %p1300_p6 = pnand %p1299_p5, %p1293_p8 }
  0x34   : > { %1303 = shalt.err (!%p1300_p6)
}
  0x35   : > { %1157 = dma.hbm_to_vmem [thread:$0]  (!%p1485_p12), %s1699_s5, 3072, %s252_s20, [#allocation6], %s1377_s22, %s1377_s22, %s1378_s23  }
  0x36   : > { %284 = sbr.rel (%p1477_p10) target bundleno = 1398 (0x576), region = 48  ;;  %p1708_p9 = scmp.eq.s32.totalorder (!%p1477_p10), %s1449_s28, 0 }
  0x3b   : > { %1347 = dma.done.wait (%p1708_p9), [#allocation3], 256   ;;  %p1709_p13 = pmov %p1708_p9 }
  0x3c   : > { %p1710_p1 = pmov %p1708_p9 }
  0x3d   : > { %1349 = vsyncadd (%p1709_p13), [#allocation3], 4294967040 }
  0x3e   : > { %1351 = dma.done.wait (%p1710_p1), [#allocation6], 6144   ;;  %p1711_p5 = pmov %p1710_p1 }
  0x3f   : > { %p327_p3 = scmp.lt.s32.totalorder %s1449_s28, 1  ;;  %v1379_v0 = vmov 0.0   ;;  %vm1380_vm0 = vmmov 0   ;;  %v1381_v1 = vmov 0   ;;  %v338_v2 = vld [vmem:[#allocation2 + $0x8] sm:$0xff]  ;;  %v337_v3 = vld [vmem:[#allocation2] sm:$0xff]  ;;  %v413_v13 = vlaneseq }
  0x40   : > { %1353 = vsyncadd (%p1711_p5), [#allocation6], 4294961152  ;;  %1112 = vmatprep.subr.mxu0 %v1379_v0  ;;  %1116 = vmatprep.mubr.msk.f32.mxu0 %vm1380_vm0, %v1379_v0  ;;  %vm339_vm1 = vcmask 130048   ;;  %v1382_v7 = vmov 1   ;;  %v1383_v8 = vmov 2   ;;  %s1384_s9 = smov 2  }
  0x41   : > { %s328_s13 = scalar_select %p327_p3, %s1449_s28, 1  ;;  %1214 = vset.pattern.permute.xlu0 %v1381_v1  ;;  %1119 = vmatprep.subr.mxu1 %v1379_v0  ;;  %v1552_v14 = vshrl.u32 %v413_v13, 7  ;;  %v479_v15 = vand.u32 127, %v413_v13  ;;  %vm493_vm5 = vcmask 1041408   ;;  %vm490_vm13 = vcmask 15360   ;;  %v737_v57 = vld [vmem:[#allocation5 + $0x78] sm:$0xff] }
  0x42   : > { %1121 = vmatprep.mubr.msk.f32.mxu1 %vm1380_vm0, %v1379_v0  ;;  %1113 = vmatpush3.msra.mxu0 %v338_v2  ;;  %s1385_s14 = smov 62   ;;  %v736_v58 = vld [vmem:[#allocation5 + $0x70] sm:$0xff]  ;;  %v735_v59 = vld [vmem:[#allocation5 + $0x68] sm:$0xff]  ;;  %v734_v60 = vld [vmem:[#allocation5 + $0x60] sm:$0xff]  ;;  %s1386_s17 = smov 64   ;;  %vm759_vm15 = vcmask 523264  }
  0x43   : > { %s1085_s16 = sshll.u32 %s328_s13, 3  ;;  %1114 = vmatprep.subr.mxu0 %v1379_v0  ;;  %1216 = vset.pattern.permute.xlu1 %v1383_v8  ;;  %v480_v16 = vmul.u32 32, %v1552_v14  ;;  %v733_v61 = vld [vmem:[#allocation5 + $0x58] sm:$0xff]  ;;  %v732_v62 = vld [vmem:[#allocation5 + $0x50] sm:$0xff]  ;;  %v731_v63 = vld [vmem:[#allocation5 + $0x48] sm:$0xff]  ;;  %s324_s21 = sand.u32 1, %s1364_s25  }
  0x44   : > { %s330_s22 = scalar_lea.vmem %s1694_s0, %s1085_s16  ;;  %s334_s8 = scalar_lea.vmem %s1695_s1, %s1085_s16  ;;  %1115 = vmatpush3.msra.mxu0 %v337_v3  ;;  %v729_v2 = vld [vmem:[#allocation5 + $0x38] sm:$0xff]  ;;  %v728_v3 = vld [vmem:[#allocation5 + $0x30] sm:$0xff] }
  0x45   : > { %v335_v4 = vld [vmem:[%s330_s22] sm:$0xff]  ;;  %1129 = vmatprep.subr.mxu0 %v1379_v0  ;;  %vm481_vm3 = vcmp.ge.s32.totalorder %v479_v15, %v480_v16  ;;  %v482_v17 = vadd.s32 32, %v480_v16  ;;  %v745_v13 = vld [vmem:[#allocation5 + $0xb8] sm:$0xff]  ;;  %v743_v16 = vld [vmem:[#allocation5 + $0xa8] sm:$0xff]  ;;  %s1084_s13 = sshll.u32 %s324_s21, 3  ;;  %s1100_s20 = sshll.u32 %s1449_s28, 7 }
  0x46   : > { %v336_v5 = vld [vmem:[%s334_s8] sm:$0xff]  ;;  %1117 = vmatmul.mubr.msk.f32.vlgmr.msra.gmra.mxu0 %vm339_vm1, %v335_v4  ;;  %v727_v4 = vld [vmem:[#allocation5 + $0x28] sm:$0xff]  ;;  %s326_s22 = scalar_lea.vmem [#allocation8], %s1084_s13  ;;  %p1716_p12 = scmp.ne.s32.totalorder %s1704_s11, 0 }
  0x47   : > { %vm420_vm2 = vcmp.gt.f32.partialorder %v336_v5, 0.0  ;;  %1131 = vmatprep.mubr.msk.f32.mxu0 %vm1380_vm0, %v1379_v0  ;;  %vm483_vm4 = vcmp.lt.s32.totalorder %v479_v15, %v482_v17  ;;  %v726_v5 = vld [vmem:[#allocation5 + $0x20] sm:$0xff]  ;;  %v744_v15 = vld [vmem:[#allocation5 + $0xb0] sm:$0xff]  ;;  %s972_s23 = sshll.u32 %s326_s22, 4  ;;  %s1387_s15 = smov [#allocation8]   ;;  %s973_s23 = int_to_ptr.vmem [resolvable:$true] %s972_s23 }
  0x48   : > { %v429_v6 = vsel %vm420_vm2, 1, %v1381_v1  ;;  %vm484_vm6 = vmand %vm481_vm3, %vm483_vm4  ;;  %v730_v1 = vld [vmem:[#allocation5 + $0x40] sm:$0xff]  ;;  %s1308_s28 = sshll.u32 %s1387_s15, 4  ;;  %s1309_s28 = int_to_ptr.vmem [resolvable:$false] %s1308_s28 }
  0x49   : > { %431 = vperm.xlu0 %1214, %v429_v6   ;;  %v1088_v18 = vsel %vm484_vm6, 1.0, %v1379_v0  ;;  %v742_v17 = vld [vmem:[#allocation5 + $0xa0] sm:$0xff]  ;;  %s1310_s19 = scalar_lea.vmem %s1309_s28, 256  ;;  %p1311_p7 = scmp.lt.s32.totalorder %s973_s23, %s1309_s28 }
  0x4a   : > { %1120 = vmatpush3.msk.msra.mxu1 %vm493_vm5, %v1088_v18  ;;  %1130 = vmatpush3.msk.msra.mxu0 %vm493_vm5, %v1088_v18 }
  0x4b   : > { %1124 = vmatprep.subr.mxu1 %v1379_v0  ;;  %884 = vmatprep.subr.mxu0 %v1379_v0 }
  0x4d   : > { %1215 = vset.pattern.permute.xlu0 %v1382_v7  ;;  %v724_v7 = vld [vmem:[#allocation5 + $0x10] sm:$0xff] }
  0x4e   : > { %444 = vperm.xlu0 %1215, %v429_v6  }
  0x52   : > { %1217 = vset.pattern.permute.xlu0 %v1383_v8  ;;  %v723_v8 = vld [vmem:[#allocation5 + $0x8] sm:$0xff] }
  0xc4   : > { %v432_v19 = vpop.permute.xlu0 %431 }
  0xc5   : > { %vm433_vm9 = vcmp.eq.s32.totalorder %v432_v19, 1  ;;  %v740_v19 = vld [vmem:[#allocation5 + $0x90] sm:$0xff] }
  0xc9   : > { %v445_v21 = vpop.permute.xlu0 %444 }
  0xca   : > { %vm446_vm10 = vcmp.eq.s32.totalorder %v445_v21, 1  ;;  %v738_v21 = vld [vmem:[#allocation5 + $0x80] sm:$0xff] }
 0x106   : > { %v1543_v9 = vpop.f32.mrf.mxu0 }
 0x107   : > { %436 = vrot.lane.b32.xlu1 %v1543_v9, %s1384_s9  ;;  %v419_v10 = vrot.slane %v1543_v9, 1  ;;  %v418_v12 = vrot.slane %v1543_v9, 7 }
 0x108   : > { %v1118_v11 = vpop.f32.mrf.mxu0 }
 0x109   : > { %449 = vrot.lane.b32.xlu0 %v419_v10, %s1384_s9  ;;  %v722_v11 = vld [vmem:[#allocation5] sm:$0xff] }
 0x10b   : > { %422 = vrot.lane.b32.xlu1 %v418_v12, %s1384_s9  ;;  %s1658_s9 = scalar_lea.hbm %s1701_s7, %s1100_s20 }
 0x10f   : > { %457 = vperm.xlu1 %1216, %v429_v6   ;;  %v725_v6 = vld [vmem:[#allocation5 + $0x18] sm:$0xff] }
 0x179   : > { %v437_v20 = vpop.permute.xlu1 %436 }
 0x17a   : > { %v439_v24 = vadd.f32 %v437_v20, %v1543_v9  ;;  %v739_v20 = vld [vmem:[#allocation5 + $0x88] sm:$0xff] }
 0x17b   : > { %v450_v25 = vpop.permute.xlu0 %449 }
 0x17c   : > { %v441_v27 = vmul.f32 0.2, %v439_v24  ;;  %v452_v28 = vadd.f32 %v450_v25, %v1543_v9  ;;  %vm440_vm8 = vcmp.gt.f32.partialorder %v439_v24, 0.0 }
 0x17d   : > { %v423_v22 = vpop.permute.xlu1 %422 }
 0x17e   : > { %v425_v23 = vadd.f32 %v423_v22, %v1543_v9  ;;  %v442_v30 = vsel %vm440_vm8, %v439_v24, %v441_v27  ;;  %v454_v31 = vmul.f32 0.2, %v452_v28  ;;  %vm453_vm11 = vcmp.gt.f32.partialorder %v452_v28, 0.0 }
 0x17f   : > { %v447_v33 = vsel %vm446_vm10, -9e+15, %v442_v30  ;;  %v415_v30 = vand.u32 7, %v1552_v14 }
 0x180   : > { %v427_v26 = vmul.f32 0.2, %v425_v23  ;;  %vm426_vm7 = vcmp.gt.f32.partialorder %v425_v23, 0.0  ;;  %v455_v35 = vsel %vm453_vm11, %v452_v28, %v454_v31 }
 0x181   : > { %vm1598_vm14 = vcmp.eq.s32.totalorder %v415_v30, 7 }
 0x182   : > { %v428_v29 = vsel %vm426_vm7, %v425_v23, %v427_v26 }
 0x183   : > { %v434_v32 = vsel %vm433_vm9, -9e+15, %v428_v29 }
 0x184   : > { %v461_v36 = vmax.f32 %v434_v32, %v447_v33 }
 0x18a   : > { %v458_v34 = vpop.permute.xlu1 %457 }
 0x18b   : > { %vm459_vm12 = vcmp.eq.s32.totalorder %v458_v34, 1 }
 0x18c   : > { %v460_v37 = vsel %vm459_vm12, -9e+15, %v455_v35 }
 0x18d   : > { %v462_v38 = vmax.f32 %v461_v36, %v460_v37 }
 0x18f   : > { %v463_v39 = vsub.f32 %v434_v32, %v462_v38  ;;  %v466_v40 = vsub.f32 %v447_v33, %v462_v38  ;;  %v469_v41 = vsub.f32 %v460_v37, %v462_v38  ;;  %v856_v38 = vld [vmem:[#allocation7 + $0x78] sm:$0xff] }
 0x191   : > { %v464_v42 = vmul.f32 1.442695, %v463_v39  ;;  %v467_v43 = vmul.f32 1.442695, %v466_v40  ;;  %v470_v44 = vmul.f32 1.442695, %v469_v41 }
 0x192   : > { %v855_v39 = vld [vmem:[#allocation7 + $0x70] sm:$0xff]  ;;  %v854_v40 = vld [vmem:[#allocation7 + $0x68] sm:$0xff]  ;;  %v853_v41 = vld [vmem:[#allocation7 + $0x60] sm:$0xff] }
 0x193   : > { %1218 = vpow2.f32 %v464_v42  ;;  %v852_v42 = vld [vmem:[#allocation7 + $0x58] sm:$0xff] }
 0x194   : > { %1220 = vpow2.f32 %v467_v43  ;;  %v851_v43 = vld [vmem:[#allocation7 + $0x50] sm:$0xff] }
 0x195   : > { %1222 = vpow2.f32 %v470_v44  ;;  %v850_v44 = vld [vmem:[#allocation7 + $0x48] sm:$0xff] }
 0x1a0   : > { %v1219_v45 = vpop.eup %1218 }
 0x1a1   : > { %v1221_v46 = vpop.eup %1220 }
 0x1a2   : > { %v472_v47 = vadd.f32 %v1221_v46, %v1219_v45  ;;  %v1223_v48 = vpop.eup %1222 }
 0x1a4   : > { %v473_v49 = vadd.f32 %v1223_v48, %v472_v47  ;;  %v847_v47 = vld [vmem:[#allocation7 + $0x30] sm:$0xff] }
 0x1a6   : > { %1224 = vrcp.f32 %v473_v49  ;;  %v845_v49 = vld [vmem:[#allocation7 + $0x20] sm:$0xff] }
 0x1b3   : > { %v1225_v50 = vpop.eup %1224 }
 0x1b4   : > { %v476_v51 = vmul.f32 %v1225_v50, %v1221_v46  ;;  %v475_v52 = vmul.f32 %v1225_v50, %v1219_v45  ;;  %v477_v53 = vmul.f32 %v1225_v50, %v1223_v48  ;;  %v849_v45 = vld [vmem:[#allocation7 + $0x40] sm:$0xff]  ;;  %v848_v46 = vld [vmem:[#allocation7 + $0x38] sm:$0xff]  ;;  %v846_v48 = vld [vmem:[#allocation7 + $0x28] sm:$0xff] }
 0x1b5   : > { %v844_v50 = vld [vmem:[#allocation7 + $0x18] sm:$0xff] }
 0x1b6   : > { %569 = vrot.lane.b32.xlu0 %v476_v51, %s1385_s14  ;;  %488 = vrot.lane.b32.xlu1 %v475_v52, %s1385_s14  ;;  %v843_v51 = vld [vmem:[#allocation7 + $0x10] sm:$0xff]  ;;  %v842_v52 = vld [vmem:[#allocation7 + $0x8] sm:$0xff] }
 0x1ba   : > { %646 = vrot.lane.b32.xlu1 %v477_v53, %s1385_s14  ;;  %v841_v53 = vld [vmem:[#allocation7] sm:$0xff]  ;;  %s959_s14 = scalar_lea.sflag [#allocation4], %s324_s21 }
 0x228   : > { %v489_v54 = vpop.permute.xlu1 %488  ;;  %v570_v55 = vpop.permute.xlu0 %569 }
 0x229   : > { %1122 = vmatmul.mubr.msk.f32.vlgmr.msra.gmra.mxu1 %vm490_vm13, %v489_v54  ;;  %v864_v54 = vld [vmem:[#allocation7 + $0xb8] sm:$0xff] }
 0x22a   : > { %1125 = vmatpush3.msk.msra.mxu1 %vm493_vm5, %v1088_v18  ;;  %1126 = vmatprep.mubr.msk.f32.mxu1 %vm1380_vm0, %v1379_v0  ;;  %v741_v18 = vld [vmem:[#allocation5 + $0x98] sm:$0xff]  ;;  %vm1609_vm0 = vcmp.eq.s32.totalorder %v415_v30, 0 }
 0x22b   : > { %770 = vmatprep.subr.mxu1 %v1379_v0 }
 0x22c   : > { %v647_v56 = vpop.permute.xlu1 %646 }
 0x22d   : > { %1127 = vmatmul.mubr.msk.f32.vlgmr.msra.gmra.mxu1 %vm490_vm13, %v570_v55  ;;  %1132 = vmatmul.mubr.msk.f32.vlgmr.msra.gmra.mxu0 %vm490_vm13, %v647_v56  ;;  %v863_v55 = vld [vmem:[#allocation7 + $0xb0] sm:$0xff]  ;;  %v862_v56 = vld [vmem:[#allocation7 + $0xa8] sm:$0xff] }
 0x22e   : > { %771 = vmatpush1.msra.mxu1 %v737_v57  ;;  %885 = vmatpush1.msra.mxu0 %v856_v38  ;;  %v861_v57 = vld [vmem:[#allocation7 + $0xa0] sm:$0xff] }
 0x22f   : > { %772 = vmatprep.subr.mxu1 %v1379_v0  ;;  %886 = vmatprep.subr.mxu0 %v1379_v0 }
 0x230   : > { %773 = vmatpush1.msra.mxu1 %v736_v58  ;;  %887 = vmatpush1.msra.mxu0 %v855_v39  ;;  %v860_v58 = vld [vmem:[#allocation7 + $0x98] sm:$0xff] }
 0x231   : > { %774 = vmatprep.subr.mxu1 %v1379_v0  ;;  %888 = vmatprep.subr.mxu0 %v1379_v0 }
 0x232   : > { %775 = vmatpush1.msra.mxu1 %v735_v59  ;;  %889 = vmatpush1.msra.mxu0 %v854_v40  ;;  %v859_v59 = vld [vmem:[#allocation7 + $0x90] sm:$0xff] }
 0x233   : > { %776 = vmatprep.subr.mxu1 %v1379_v0  ;;  %890 = vmatprep.subr.mxu0 %v1379_v0 }
 0x234   : > { %777 = vmatpush1.msra.mxu1 %v734_v60  ;;  %891 = vmatpush1.msra.mxu0 %v853_v41  ;;  %v858_v60 = vld [vmem:[#allocation7 + $0x88] sm:$0xff] }
 0x235   : > { %778 = vmatprep.subr.mxu1 %v1379_v0  ;;  %892 = vmatprep.subr.mxu0 %v1379_v0 }
 0x236   : > { %779 = vmatpush1.msra.mxu1 %v733_v61  ;;  %893 = vmatpush1.msra.mxu0 %v852_v42  ;;  %v857_v61 = vld [vmem:[#allocation7 + $0x80] sm:$0xff] }
 0x237   : > { %780 = vmatprep.subr.mxu1 %v1379_v0  ;;  %894 = vmatprep.subr.mxu0 %v1379_v0 }
 0x238   : > { %781 = vmatpush1.msra.mxu1 %v732_v62  ;;  %895 = vmatpush1.msra.mxu0 %v851_v43  ;;  %v1095_v62 = vld [vmem:[%s1698_s4] ss:$0 sm:$0xff] }
 0x239   : > { %782 = vmatprep.subr.mxu1 %v1379_v0  ;;  %896 = vmatprep.subr.mxu0 %v1379_v0 }
 0x23a   : > { %783 = vmatpush1.msra.mxu1 %v731_v63  ;;  %897 = vmatpush1.msra.mxu0 %v850_v44 }
 0x23b   : > { %784 = vmatprep.subr.mxu1 %v1379_v0  ;;  %898 = vmatprep.subr.mxu0 %v1379_v0 }
 0x23c   : > { %785 = vmatpush1.msra.mxu1 %v730_v1  ;;  %899 = vmatpush1.msra.mxu0 %v849_v45 }
 0x23d   : > { %786 = vmatprep.subr.mxu1 %v1379_v0  ;;  %900 = vmatprep.subr.mxu0 %v1379_v0 }
 0x23e   : > { %787 = vmatpush1.msra.mxu1 %v729_v2  ;;  %901 = vmatpush1.msra.mxu0 %v848_v46 }
 0x23f   : > { %788 = vmatprep.subr.mxu1 %v1379_v0  ;;  %902 = vmatprep.subr.mxu0 %v1379_v0 }
 0x240   : > { %789 = vmatpush1.msra.mxu1 %v728_v3  ;;  %903 = vmatpush1.msra.mxu0 %v847_v47 }
 0x241   : > { %790 = vmatprep.subr.mxu1 %v1379_v0  ;;  %904 = vmatprep.subr.mxu0 %v1379_v0 }
 0x242   : > { %791 = vmatpush1.msra.mxu1 %v727_v4  ;;  %905 = vmatpush1.msra.mxu0 %v846_v48 }
 0x243   : > { %792 = vmatprep.subr.mxu1 %v1379_v0  ;;  %906 = vmatprep.subr.mxu0 %v1379_v0 }
 0x244   : > { %793 = vmatpush1.msra.mxu1 %v726_v5  ;;  %907 = vmatpush1.msra.mxu0 %v845_v49 }
 0x245   : > { %794 = vmatprep.subr.mxu1 %v1379_v0  ;;  %908 = vmatprep.subr.mxu0 %v1379_v0 }
 0x246   : > { %795 = vmatpush1.msra.mxu1 %v725_v6  ;;  %909 = vmatpush1.msra.mxu0 %v844_v50 }
 0x247   : > { %796 = vmatprep.subr.mxu1 %v1379_v0  ;;  %910 = vmatprep.subr.mxu0 %v1379_v0 }
 0x248   : > { %797 = vmatpush1.msra.mxu1 %v724_v7  ;;  %911 = vmatpush1.msra.mxu0 %v843_v51 }
 0x249   : > { %798 = vmatprep.subr.mxu1 %v1379_v0  ;;  %912 = vmatprep.subr.mxu0 %v1379_v0 }
 0x24a   : > { %799 = vmatpush1.msra.mxu1 %v723_v8  ;;  %913 = vmatpush1.msra.mxu0 %v842_v52 }
 0x24b   : > { %800 = vmatprep.subr.mxu1 %v1379_v0  ;;  %914 = vmatprep.subr.mxu0 %v1379_v0 }
 0x24c   : > { %801 = vmatpush1.msra.mxu1 %v722_v11  ;;  %915 = vmatpush1.msra.mxu0 %v841_v53  ;;  %v1097_v11 = vld [vmem:[%s1700_s6] ss:$0 sm:$0xff] }
 0x24d   : > { %818 = vmatprep.subr.mxu1 %v1379_v0  ;;  %932 = vmatprep.subr.mxu0 %v1379_v0 }
 0x24e   : > { %819 = vmatpush2.msra.mxu1 %v745_v13  ;;  %933 = vmatpush2.msra.mxu0 %v864_v54 }
 0x24f   : > { %820 = vmatprep.subr.mxu1 %v1379_v0  ;;  %934 = vmatprep.subr.mxu0 %v1379_v0 }
 0x250   : > { %821 = vmatpush2.msra.mxu1 %v744_v15  ;;  %935 = vmatpush2.msra.mxu0 %v863_v55 }
 0x251   : > { %822 = vmatprep.subr.mxu1 %v1379_v0  ;;  %936 = vmatprep.subr.mxu0 %v1379_v0 }
 0x252   : > { %823 = vmatpush2.msra.mxu1 %v743_v16  ;;  %937 = vmatpush2.msra.mxu0 %v862_v56 }
 0x253   : > { %824 = vmatprep.subr.mxu1 %v1379_v0  ;;  %938 = vmatprep.subr.mxu0 %v1379_v0 }
 0x254   : > { %825 = vmatpush2.msra.mxu1 %v742_v17  ;;  %939 = vmatpush2.msra.mxu0 %v861_v57 }
 0x255   : > { %826 = vmatprep.subr.mxu1 %v1379_v0  ;;  %940 = vmatprep.subr.mxu0 %v1379_v0 }
 0x256   : > { %827 = vmatpush2.msra.mxu1 %v741_v18  ;;  %941 = vmatpush2.msra.mxu0 %v860_v58 }
 0x257   : > { %828 = vmatprep.subr.mxu1 %v1379_v0  ;;  %942 = vmatprep.subr.mxu0 %v1379_v0 }
 0x258   : > { %829 = vmatpush2.msra.mxu1 %v740_v19  ;;  %943 = vmatpush2.msra.mxu0 %v859_v59 }
 0x259   : > { %830 = vmatprep.subr.mxu1 %v1379_v0  ;;  %944 = vmatprep.subr.mxu0 %v1379_v0 }
 0x25a   : > { %831 = vmatpush2.msra.mxu1 %v739_v20  ;;  %945 = vmatpush2.msra.mxu0 %v858_v60 }
 0x25b   : > { %832 = vmatprep.subr.mxu1 %v1379_v0  ;;  %946 = vmatprep.subr.mxu0 %v1379_v0 }
 0x25c   : > { %833 = vmatpush2.msra.mxu1 %v738_v21  ;;  %947 = vmatpush2.msra.mxu0 %v857_v61 }
 0x2e9   : > { %v563_v22 = vpop.f32.mrf.mxu1 }
 0x2ea   : > { %v567_v26 = vmul.f32 %v563_v22, %v418_v12 }
 0x2eb   : > { %v1123_v23 = vpop.f32.mrf.mxu1 }
 0x2ed   : > { %v639_v24 = vpop.f32.mrf.mxu1  ;;  %v716_v25 = vpop.f32.mrf.mxu0 }
 0x2ee   : > { %v643_v27 = vmul.f32 %v639_v24, %v1543_v9  ;;  %v720_v32 = vmul.f32 %v716_v25, %v419_v10 }
 0x2ef   : > { %v1128_v28 = vpop.f32.mrf.mxu1  ;;  %v1133_v29 = vpop.f32.mrf.mxu0 }
 0x2f0   : > { %v644_v31 = vadd.f32 %v643_v27, %v567_v26 }
 0x2f2   : > { %v1596_v33 = vadd.f32 %v720_v32, %v644_v31 }
 0x2f4   : > { %756 = vrot.lane.b32.xlu0 %v1596_v33, %s1386_s17  ;;  %v751_v12 = vrot.slane %v1596_v33, 1  ;;  %v747_v9 = vrot.slane %v1596_v33, 7 }
 0x2f6   : > { %v754_v14 = vsel %vm1598_vm14, 0.0, %v751_v12  ;;  %v750_v36 = vsel %vm1609_vm0, 0.0, %v747_v9 }
 0x2f7   : > { %1096 = vmatprep.mubr.msk.f32.mxu1 %vm759_vm15, %v754_v14 }
 0x366   : > { %v757_v35 = vpop.permute.xlu0 %756 }
 0x367   : > { %v760_v37 = vsel %vm759_vm15, %v750_v36, %v757_v35 }
 0x368   : > { %835 = vmatmul.mubr.f32.vlgmr.msra.gmra.mxu1 %v760_v37 }
 0x428   : > { %v836_v63 = vpop.f32.mrf.mxu1 }
 0x429   : > { %v837_v1 = vadd.f32 %v1095_v62, %v836_v63 }
 0x42a   : > { %v838_v2 = vpop.f32.mrf.mxu1 }
 0x42b   : > { %v840_v3 = vmax.f32 %v837_v1, 0.0 }
 0x42d   : > { %871 = vrot.lane.b32.xlu1 %v840_v3, %s1386_s17  ;;  %v868_v4 = vrot.slane %v840_v3, 1  ;;  %v866_v0 = vrot.slane %v840_v3, 7  ;;  %s1304_s17 = scalar_lea.vmem %s973_s23, 128 }
 0x42e   : > { %p1305_p10 = scmp.ne.s32.totalorder %s973_s23, %s1304_s17  ;;  %p1312_p8 = scmp.lt.s32.totalorder %s1310_s19, %s1304_s17 }
 0x42f   : > { %v869_v5 = vsel %vm1598_vm14, 0.0, %v868_v4  ;;  %v867_v7 = vsel %vm1609_vm0, 0.0, %v866_v0 }
 0x430   : > { %1098 = vmatprep.mubr.msk.f32.mxu0 %vm759_vm15, %v869_v5  ;;  %p1306_p2 = pnand %p1305_p10, %p1716_p12  ;;  %p1313_p11 = por %p1312_p8, %p1311_p7 }
 0x432   : > { %p1307_p4 = pneg %p1306_p2 }
 0x434   : > { %p1314_p0 = pnand %p1313_p11, %p1307_p4 }
 0x49f   : > { %v872_v6 = vpop.permute.xlu1 %871 }
 0x4a0   : > { %v874_v8 = vsel %vm759_vm15, %v867_v7, %v872_v6 }
 0x4a1   : > { %949 = vmatmul.mubr.f32.vlgmr.msra.gmra.mxu0 %v874_v8 }
 0x561   : > { %v950_v13 = vpop.f32.mrf.mxu0 }
 0x562   : > { %v951_v15 = vadd.f32 %v1097_v11, %v950_v13 }
 0x563   : > { %v952_v16 = vpop.f32.mrf.mxu0 }
 0x564   : > { %v954_v17 = vadd.f32 %v951_v15, %v1596_v33 }
 0x566   : > { %v955_v18 = vmax.f32 %v954_v17, 0.0 }
 0x568   : > { %v956_v19 = vsel %vm759_vm15, %v955_v18, 0.0 }
 0x569   : > { %957 = vst [vmem:[%s326_s22] sm:$0xff] %v956_v19 }
 0x56a   : > { %1317 = shalt.err (!%p1314_p0)
}
 0x56b   : > { %s1318_s13 = scalar_lea.hbm %s1658_s9, 128  ;;  %s1322_s18 = scalar_lea.hbm %s1701_s7, 256 }
 0x56c   : > { %p1319_p6 = scmp.ne.s32.totalorder %s1658_s9, %s1318_s13  ;;  %p1323_p1 = scmp.lt.s32.totalorder %s1658_s9, %s1701_s7 }
 0x56d   : > { %p1324_p5 = scmp.lt.s32.totalorder %s1322_s18, %s1318_s13 }
 0x56e   : > { %p1320_p9 = pnand %p1319_p6, %p1716_p12 }
 0x56f   : > { %p1325_p3 = por %p1324_p5, %p1323_p1 }
 0x570   : > { %p1321_p13 = pneg %p1320_p9 }
 0x572   : > { %p1326_p10 = pnand %p1325_p3, %p1321_p13 }
 0x574   : > { %1329 = shalt.err (!%p1326_p10)
}
 0x575   : > { %1146 = dma.vmem_to_hbm [thread:$0]  (%p1716_p12), %s973_s23, 128, %s1658_s9, %s959_s14  }
 0x576 PF: > { %p1168_p2 = scmp.ge.s32.totalorder %s1372_s27, 2  ;;  %s984_s29 = sand.u32 1, %s1360_s24  }
 0x577   : > { %p1717_p4 = scmp.ne.s32.totalorder %s1705_s12, 0  ;;  %s985_s8 = scalar_lea.sflag [#allocation4], %s984_s29 }
 0x579   : > { %p1159_p7 = pnand %p1168_p2, %p1717_p4 }
 0x57b   : > { %p1160_p8 = pneg %p1159_p7 }
 0x57d   : > { %1355 = dma.done.wait (%p1160_p8), %s985_s8, 128  }
 0x57e   : > { %1357 = vsyncadd (%p1160_p8), %s985_s8, 4294967168  ;;  %p19_p11 = scmp.ge.s32.totalorder %s1453_s30, 4   ;;  %s1718_s24 = smov %s1364_s25 }
 0x57f   : > { %s1719_s25 = smov %s1368_s26  ;;  %s1720_s26 = smov %s1464_s10 }
 0x580   : > { %s1721_s27 = smov %s1453_s30  ;;  %21 = sbr.rel (!%p19_p11) target bundleno = 5 (0x5), region = 99 }
 0x585   :  { %990 = vsyncpa [#allocation3], 1 }
 0x586   :  { %992 = vsyncpa [#allocation3 + $0x1], 1 }
 0x587   :  { %993 = vsyncpa [#allocation6], 1 }
 0x588   :  { %994 = vsyncpa [#allocation4], 1 }
 0x589   :  { %996 = vsyncpa [#allocation4 + $0x1], 1 }

</bundles_post_ra>
